<compile_context>
chip_gen: v7x
topology: tpu7x:2x2x1
jax: 0.10.0
libtpu: 0.0.40
codegen_flags: <defaults>
</compile_context>

<pallas_src>
from functools import partial

import jax
import jax.numpy as jnp
from jax.experimental import pallas as pl
from jax.experimental.pallas import tpu as pltpu

_TARGET_TB = 4096  # batch tile (lanes); multiple of 128


def mlp_kernel(xT_ref, w1t_ref, b1t_ref, w2t_ref, b2t_ref, w3t_ref, b3t_ref, oT_ref):
    # All activations are kept transposed: feature axis on sublanes, batch on lanes.
    xT = xT_ref[...]                                               # (3, TB)

    # Layer 1: (128,3) @ (3,TB) -> (128,TB).  K=3 is negligible work; a single MXU
    # pass against the VMEM-resident w1^T avoids any cross-lane extracts.
    h1 = jnp.dot(w1t_ref[...], xT, preferred_element_type=jnp.float32) + b1t_ref[...]
    h1 = jnp.maximum(h1, 0.0)                                      # (128, TB)

    # Layer 2: (64,128) @ (128,TB) -> (64,TB), f32 accumulation.
    h2 = jnp.dot(w2t_ref[...], h1, preferred_element_type=jnp.float32) + b2t_ref[...]
    h2 = jnp.maximum(h2, 0.0)                                      # (64, TB)

    # Layer 3: (2,64) @ (64,TB) -> (2,TB); narrow sublane dim, lane-dense store.
    y = jnp.dot(w3t_ref[...], h2, preferred_element_type=jnp.float32) + b3t_ref[...]
    oT_ref[...] = y.astype(oT_ref.dtype)                          # (2, TB)


def prepare_params(w1, b1, w2, b2, w3, b3):
    """One-time layout work (hoisted out of the per-call path).

    Weights arrive in (in, out) layout; we store them transposed for the
    transposed kernel formulation, and biases as (out, 1) columns.
    """
    f32 = jnp.float32
    return dict(
        w1t=jnp.asarray(w1, f32).T,                         # (128, 3)
        b1t=jnp.reshape(jnp.asarray(b1, f32), (-1, 1)),     # (128, 1)
        w2t=jnp.asarray(w2, f32).T,                         # (64, 128)
        b2t=jnp.reshape(jnp.asarray(b2, f32), (-1, 1)),     # (64, 1)
        w3t=jnp.asarray(w3, f32).T,                         # (2, 64)
        b3t=jnp.reshape(jnp.asarray(b3, f32), (-1, 1)),     # (2, 1)
    )


def _choose_batch_tile(B, target_tb):
    """Lane-aligned batch tile; keep >= 2 grid steps when the batch allows (v7x)."""
    LANES = 128
    b128 = pl.cdiv(B, LANES) * LANES
    if b128 >= 2 * LANES:
        cap = max(LANES, (b128 // 2) // LANES * LANES)
    else:
        cap = b128
    return max(LANES, min(target_tb, cap))


@partial(jax.jit, static_argnames=())
def mlp_forward(x, params):
    """x: (B, 3) f32 -> (B, 2) f32."""
    B, K = x.shape
    H1 = params["w1t"].shape[0]        # 128
    H2 = params["w2t"].shape[0]        # 64
    N = params["w3t"].shape[0]         # 2

    TB = _choose_batch_tile(B, _TARGET_TB)
    B_pad = pl.cdiv(B, TB) * TB

    # Lane-dense input layout: batch on the lane axis.  Padded rows are zeros and are
    # discarded by the final slice.
    xT = jnp.transpose(x).astype(jnp.float32)              # (3, B)
    if B_pad != B:
        xT = jnp.pad(xT, ((0, 0), (0, B_pad - B)))

    grid = (B_pad // TB,)
    const = lambda i: (0, 0)           # weights/biases stay VMEM-resident across tiles

    yT = pl.pallas_call(
        mlp_kernel,
        out_shape=jax.ShapeDtypeStruct((N, B_pad), jnp.float32),
        grid=grid,
        in_specs=[
            pl.BlockSpec((K, TB), lambda i: (0, i)),        # x^T streams per batch tile
            pl.BlockSpec((H1, K), const),                   # w1^T
            pl.BlockSpec((H1, 1), const),                   # b1
            pl.BlockSpec((H2, H1), const),                  # w2^T
            pl.BlockSpec((H2, 1), const),                   # b2
            pl.BlockSpec((N, H2), const),                   # w3^T
            pl.BlockSpec((N, 1), const),                    # b3
        ],
        out_specs=pl.BlockSpec((N, TB), lambda i: (0, i)),  # narrow, lane-dense output
        compiler_params=pltpu.CompilerParams(
            dimension_semantics=("parallel",),              # shard batch tiles across TCs
        ),
    )(xT, params["w1t"], params["b1t"], params["w2t"], params["b2t"],
      params["w3t"], params["b3t"])

    return jnp.transpose(yT[:, :B])                         # (B, 2)


def init_linear(key, fan_in, fan_out):
    # Deterministic init mimicking PyTorch nn.Linear default (uniform +/- 1/sqrt(fan_in)).
    kw, kb = jax.random.split(key)
    bound = 1.0 / jnp.sqrt(fan_in)
    w = jax.random.uniform(kw, (fan_in, fan_out), jnp.float32, -bound, bound)
    b = jax.random.uniform(kb, (1, fan_out), jnp.float32, -bound, bound)
    return w, b


if __name__ == "__main__":
    key = jax.random.PRNGKey(0)
    kx, k1, k2, k3 = jax.random.split(key, 4)

    B = 8
    x = jax.random.normal(kx, (B, 3), jnp.float32)

    w1, b1 = init_linear(k1, 3, 128)
    w2, b2 = init_linear(k2, 128, 64)
    w3, b3 = init_linear(k3, 64, 2)

    params = prepare_params(w1, b1, w2, b2, w3, b3)   # one-time layout work

    y = mlp_forward(x, params)
    jax.block_until_ready(y)

    # Reference check in plain JAX (same math as the PyTorch forward).
    h1 = jnp.maximum(x @ w1 + b1, 0.0)
    h2 = jnp.maximum(h1 @ w2 + b2, 0.0)
    y_ref = h2 @ w3 + b3
    assert y.shape == (B, 2)
    assert jnp.allclose(y, y_ref, atol=1e-5, rtol=1e-5)

    print("KERNEL_OK")
</pallas_src>

<mosaic_0001>
module attributes {stable_mosaic.version = 11 : i64} {
  func.func @mlp_kernel(%arg0: i32, %arg1: memref<3x128xf32, #tpu.memory_space<vmem>>, %arg2: memref<128x3xf32, #tpu.memory_space<vmem>>, %arg3: memref<128x1xf32, #tpu.memory_space<vmem>>, %arg4: memref<64x128xf32, #tpu.memory_space<vmem>>, %arg5: memref<64x1xf32, #tpu.memory_space<vmem>>, %arg6: memref<2x64xf32, #tpu.memory_space<vmem>>, %arg7: memref<2x1xf32, #tpu.memory_space<vmem>>, %arg8: memref<2x128xf32, #tpu.memory_space<vmem>>) attributes {dimension_semantics = [#tpu.dimension_semantics<parallel>], iteration_bounds = array<i64: 1>, scalar_prefetch = 0 : i64, scratch_operands = 0 : i64, tpu.core_type = #tpu.core_type<tc>, window_params = [{transform_indices = @transform_0, window_bounds = array<i64: 3, 128>}, {pipeline_mode = #tpu.pipeline_mode<synchronous>, transform_indices = @transform_1, window_bounds = array<i64: 128, 3>}, {pipeline_mode = #tpu.pipeline_mode<synchronous>, transform_indices = @transform_2, window_bounds = array<i64: 128, 1>}, {pipeline_mode = #tpu.pipeline_mode<synchronous>, transform_indices = @transform_3, window_bounds = array<i64: 64, 128>}, {pipeline_mode = #tpu.pipeline_mode<synchronous>, transform_indices = @transform_4, window_bounds = array<i64: 64, 1>}, {pipeline_mode = #tpu.pipeline_mode<synchronous>, transform_indices = @transform_5, window_bounds = array<i64: 2, 64>}, {pipeline_mode = #tpu.pipeline_mode<synchronous>, transform_indices = @transform_6, window_bounds = array<i64: 2, 1>}, {transform_indices = @transform_7, window_bounds = array<i64: 2, 128>}]} {
    %c0 = arith.constant 0 : index
    %c0_0 = arith.constant 0 : index
    %0 = vector.load %arg1[%c0, %c0_0] : memref<3x128xf32, #tpu.memory_space<vmem>>, vector<3x128xf32>
    %c0_1 = arith.constant 0 : index
    %c0_2 = arith.constant 0 : index
    %1 = vector.load %arg2[%c0_1, %c0_2] : memref<128x3xf32, #tpu.memory_space<vmem>>, vector<128x3xf32>
    %cst = arith.constant dense<0.000000e+00> : vector<128x128xf32>
    %2 = tpu.matmul %1, %0, %cst {dimension_numbers = #tpu.dot_dimension_numbers<[1], [0], [0], [1], [0, 0, 1, 1], [], []>} : vector<128x3xf32>, vector<3x128xf32>, vector<128x128xf32> -> vector<128x128xf32>
    %c0_3 = arith.constant 0 : index
    %c0_4 = arith.constant 0 : index
    %3 = vector.load %arg3[%c0_3, %c0_4] : memref<128x1xf32, #tpu.memory_space<vmem>>, vector<128x1xf32>
    %4 = vector.broadcast %3 : vector<128x1xf32> to vector<128x128xf32>
    %5 = arith.addf %2, %4 : vector<128x128xf32>
    %cst_5 = arith.constant 0.000000e+00 : f32
    %6 = vector.broadcast %cst_5 : f32 to vector<128x128xf32>
    %7 = arith.maximumf %5, %6 : vector<128x128xf32>
    %c0_6 = arith.constant 0 : index
    %c0_7 = arith.constant 0 : index
    %8 = vector.load %arg4[%c0_6, %c0_7] : memref<64x128xf32, #tpu.memory_space<vmem>>, vector<64x128xf32>
    %cst_8 = arith.constant dense<0.000000e+00> : vector<64x128xf32>
    %9 = tpu.matmul %8, %7, %cst_8 {dimension_numbers = #tpu.dot_dimension_numbers<[1], [0], [0], [1], [0, 0, 1, 1], [], []>} : vector<64x128xf32>, vector<128x128xf32>, vector<64x128xf32> -> vector<64x128xf32>
    %c0_9 = arith.constant 0 : index
    %c0_10 = arith.constant 0 : index
    %10 = vector.load %arg5[%c0_9, %c0_10] : memref<64x1xf32, #tpu.memory_space<vmem>>, vector<64x1xf32>
    %11 = vector.broadcast %10 : vector<64x1xf32> to vector<64x128xf32>
    %12 = arith.addf %9, %11 : vector<64x128xf32>
    %cst_11 = arith.constant 0.000000e+00 : f32
    %13 = vector.broadcast %cst_11 : f32 to vector<64x128xf32>
    %14 = arith.maximumf %12, %13 : vector<64x128xf32>
    %c0_12 = arith.constant 0 : index
    %c0_13 = arith.constant 0 : index
    %15 = vector.load %arg6[%c0_12, %c0_13] : memref<2x64xf32, #tpu.memory_space<vmem>>, vector<2x64xf32>
    %cst_14 = arith.constant dense<0.000000e+00> : vector<2x128xf32>
    %16 = tpu.matmul %15, %14, %cst_14 {dimension_numbers = #tpu.dot_dimension_numbers<[1], [0], [0], [1], [0, 0, 1, 1], [], []>} : vector<2x64xf32>, vector<64x128xf32>, vector<2x128xf32> -> vector<2x128xf32>
    %c0_15 = arith.constant 0 : index
    %c0_16 = arith.constant 0 : index
    %17 = vector.load %arg7[%c0_15, %c0_16] : memref<2x1xf32, #tpu.memory_space<vmem>>, vector<2x1xf32>
    %18 = vector.broadcast %17 : vector<2x1xf32> to vector<2x128xf32>
    %19 = arith.addf %16, %18 : vector<2x128xf32>
    %c0_17 = arith.constant 0 : index
    %c0_18 = arith.constant 0 : index
    %20 = vector.load %arg8[%c0_17, %c0_18] : memref<2x128xf32, #tpu.memory_space<vmem>>, vector<2x128xf32>
    tpu.vector_store %arg8[%c0_17, %c0_18], %19 {strides = array<i32>} : memref<2x128xf32, #tpu.memory_space<vmem>>, vector<2x128xf32>,
    return
  }
  func.func @transform_0(%arg0: i32) -> (i32, i32) {
    %c0_i32 = arith.constant 0 : i32
    %c0_i32_0 = arith.constant 0 : i32
    return %c0_i32, %arg0 : i32, i32
  }
  func.func @transform_1(%arg0: i32) -> (i32, i32) {
    %c0_i32 = arith.constant 0 : i32
    %c0_i32_0 = arith.constant 0 : i32
    %c0_i32_1 = arith.constant 0 : i32
    return %c0_i32, %c0_i32_0 : i32, i32
  }
  func.func @transform_2(%arg0: i32) -> (i32, i32) {
    %c0_i32 = arith.constant 0 : i32
    %c0_i32_0 = arith.constant 0 : i32
    %c0_i32_1 = arith.constant 0 : i32
    return %c0_i32, %c0_i32_0 : i32, i32
  }
  func.func @transform_3(%arg0: i32) -> (i32, i32) {
    %c0_i32 = arith.constant 0 : i32
    %c0_i32_0 = arith.constant 0 : i32
    %c0_i32_1 = arith.constant 0 : i32
    return %c0_i32, %c0_i32_0 : i32, i32
  }
  func.func @transform_4(%arg0: i32) -> (i32, i32) {
    %c0_i32 = arith.constant 0 : i32
    %c0_i32_0 = arith.constant 0 : i32
    %c0_i32_1 = arith.constant 0 : i32
    return %c0_i32, %c0_i32_0 : i32, i32
  }
  func.func @transform_5(%arg0: i32) -> (i32, i32) {
    %c0_i32 = arith.constant 0 : i32
    %c0_i32_0 = arith.constant 0 : i32
    %c0_i32_1 = arith.constant 0 : i32
    return %c0_i32, %c0_i32_0 : i32, i32
  }
  func.func @transform_6(%arg0: i32) -> (i32, i32) {
    %c0_i32 = arith.constant 0 : i32
    %c0_i32_0 = arith.constant 0 : i32
    %c0_i32_1 = arith.constant 0 : i32
    return %c0_i32, %c0_i32_0 : i32, i32
  }
  func.func @transform_7(%arg0: i32) -> (i32, i32) {
    %c0_i32 = arith.constant 0 : i32
    %c0_i32_0 = arith.constant 0 : i32
    return %c0_i32, %arg0 : i32, i32
  }
}

</mosaic_0001>

<bundles_post_ra>
// kernel: mlp_forward.1
= control target key start
LH: loop header
LB: loop body
LE: loop exit
PB: predicated region body
PF: predicated region fallthrough
CT: control target
= control target key end

     0   :  { %vm188_vm0 = vcmask 1042432   ;;  %vm139_vm1 = vcmask 23552   ;;  %v815_v3 = vmov 0   ;;  %vm817_vm2 = vmmov 0   ;;  %s1031_s0 = inlined_call_operand.vmem [shape: f32[3,128], index: 0, kind: input, shape index: {}]   ;;  %s1032_s1 = inlined_call_operand.vmem [shape: f32[128,3], index: 1, kind: input, shape index: {}]   ;;  %s1033_s2 = inlined_call_operand.vmem [shape: f32[128,1], index: 2, kind: input, shape index: {}]   ;;  %s1034_s4 = inlined_call_operand.vmem [shape: f32[64,1], index: 4, kind: input, shape index: {}]   ;;  %s1035_s6 = inlined_call_operand.vmem [shape: f32[2,1], index: 6, kind: input, shape index: {}]   ;;  %s1036_s3 = inlined_call_operand.vmem [shape: f32[64,128], index: 3, kind: input, shape index: {}]   ;;  %s1037_s5 = inlined_call_operand.vmem [shape: f32[2,64], index: 5, kind: input, shape index: {}]   ;;  %s1038_s7 = inlined_call_operand.vmem [shape: f32[2,128], index: 7, kind: output, shape index: {}]  }
   0x1   :  { %v26_v0 = vld [vmem:[%s1031_s0] sm:$0x7]  ;;  %v28_v2 = vld [vmem:[%s1032_s1 + $0x8] sm:$0xff]  ;;  %813 = vset.pattern.permute.xlu0 %v815_v3  ;;  %814 = vset.pattern.permute.xlu1 %v815_v3  ;;  %v29_v4 = vld [vmem:[%s1032_s1 + $0x10] sm:$0xff]  ;;  %vm529_vm3 = vcmask 523264  }
   0x2   :  { %v27_v1 = vld [vmem:[%s1032_s1] sm:$0xff]  ;;  %676 = vmatprep.subr.msk.mxu0 %vm188_vm0, %v26_v0  ;;  %v30_v5 = vld [vmem:[%s1032_s1 + $0x18] sm:$0xff]  ;;  %v45_v8 = vld [vmem:[%s1033_s2 + $0x10] sm:$0xff] }
   0x3   :  { %678 = vmatprep.mubr.msk.f32.mxu0 %vm139_vm1, %v27_v1  ;;  %677 = vmatpush3.msk.msra.mxu0 %vm188_vm0, %v26_v0  ;;  %v31_v6 = vld [vmem:[%s1032_s1 + $0x20] sm:$0xff]  ;;  %v44_v9 = vld [vmem:[%s1033_s2 + $0x8] sm:$0xff]  ;;  %v46_v11 = vld [vmem:[%s1033_s2 + $0x18] sm:$0xff] }
   0x4   :  { %679 = vmatmul.mubr.msk.f32.vlgmr.msra.gmra.mrb[0].mxu0 %vm139_vm1, %v28_v2  ;;  %v43_v7 = vld [vmem:[%s1033_s2] sm:$0xff]  ;;  %71 = vperm.xlu1 %814, %v45_v8   ;;  %v32_v10 = vld [vmem:[%s1032_s1 + $0x28] sm:$0xff]  ;;  %v33_v12 = vld [vmem:[%s1032_s1 + $0x30] sm:$0xff] }
   0x5   :  { %681 = vmatprep.mubr.msk.f32.mxu0 %vm139_vm1, %v29_v4  ;;  %61 = vperm.xlu0 %813, %v43_v7   ;;  %v47_v13 = vld [vmem:[%s1033_s2 + $0x20] sm:$0xff]  ;;  %v34_v14 = vld [vmem:[%s1032_s1 + $0x38] sm:$0xff]  ;;  %v48_v15 = vld [vmem:[%s1033_s2 + $0x28] sm:$0xff] }
   0x6   :  { %v35_v16 = vld [vmem:[%s1032_s1 + $0x40] sm:$0xff]  ;;  %v49_v17 = vld [vmem:[%s1033_s2 + $0x30] sm:$0xff]  ;;  %v36_v18 = vld [vmem:[%s1032_s1 + $0x48] sm:$0xff] }
   0x7   :  { %v50_v19 = vld [vmem:[%s1033_s2 + $0x38] sm:$0xff]  ;;  %v37_v20 = vld [vmem:[%s1032_s1 + $0x50] sm:$0xff]  ;;  %v51_v21 = vld [vmem:[%s1033_s2 + $0x40] sm:$0xff] }
   0x8   :  { %682 = vmatmul.mubr.msk.f32.gmra.mrb[2].mxu0 %vm139_vm1, %v30_v5  ;;  %76 = vperm.xlu1 %814, %v46_v11   ;;  %v38_v22 = vld [vmem:[%s1032_s1 + $0x58] sm:$0xff]  ;;  %v52_v23 = vld [vmem:[%s1033_s2 + $0x48] sm:$0xff]  ;;  %v39_v24 = vld [vmem:[%s1032_s1 + $0x60] sm:$0xff] }
   0x9   :  { %684 = vmatprep.mubr.msk.f32.mxu0 %vm139_vm1, %v31_v6  ;;  %66 = vperm.xlu0 %813, %v44_v9   ;;  %v53_v25 = vld [vmem:[%s1033_s2 + $0x50] sm:$0xff]  ;;  %v40_v26 = vld [vmem:[%s1032_s1 + $0x68] sm:$0xff]  ;;  %v54_v27 = vld [vmem:[%s1033_s2 + $0x58] sm:$0xff] }
   0xa   :  { %v41_v28 = vld [vmem:[%s1032_s1 + $0x70] sm:$0xff]  ;;  %v55_v29 = vld [vmem:[%s1033_s2 + $0x60] sm:$0xff]  ;;  %v42_v30 = vld [vmem:[%s1032_s1 + $0x78] sm:$0xff] }
   0xb   :  { %v56_v31 = vld [vmem:[%s1033_s2 + $0x68] sm:$0xff]  ;;  %v57_v32 = vld [vmem:[%s1033_s2 + $0x70] sm:$0xff]  ;;  %v58_v33 = vld [vmem:[%s1033_s2 + $0x78] sm:$0xff] }
   0xc   :  { %685 = vmatmul.mubr.msk.f32.gmra.mrb[4].mxu0 %vm139_vm1, %v32_v10  ;;  %86 = vperm.xlu1 %814, %v48_v15   ;;  %v361_v34 = vld [vmem:[%s1034_s4] sm:$0xff]  ;;  %v362_v35 = vld [vmem:[%s1034_s4 + $0x8] sm:$0xff]  ;;  %v363_v36 = vld [vmem:[%s1034_s4 + $0x10] sm:$0xff] }
   0xd   :  { %687 = vmatprep.mubr.msk.f32.mxu0 %vm139_vm1, %v33_v12  ;;  %81 = vperm.xlu0 %813, %v47_v13   ;;  %v364_v37 = vld [vmem:[%s1034_s4 + $0x18] sm:$0xff]  ;;  %v365_v38 = vld [vmem:[%s1034_s4 + $0x20] sm:$0xff]  ;;  %v366_v39 = vld [vmem:[%s1034_s4 + $0x28] sm:$0xff] }
   0xe   :  { %v367_v40 = vld [vmem:[%s1034_s4 + $0x30] sm:$0xff]  ;;  %v368_v41 = vld [vmem:[%s1034_s4 + $0x38] sm:$0xff]  ;;  %v523_v42 = vld [vmem:[%s1035_s6] sm:$0x3] }
   0xf   :  { %v353_v43 = vld [vmem:[%s1036_s3] sm:$0xff] }
  0x10   :  { %688 = vmatmul.mubr.msk.f32.gmra.mrb[6].mxu0 %vm139_vm1, %v34_v14  ;;  %96 = vperm.xlu1 %814, %v50_v19  }
  0x11   :  { %690 = vmatprep.mubr.msk.f32.mxu0 %vm139_vm1, %v35_v16  ;;  %91 = vperm.xlu0 %813, %v49_v17  }
  0x12   :  { %734 = vmatprep.mubr.f32.mxu1 %v353_v43 }
  0x14   :  { %691 = vmatmul.mubr.msk.f32.gmra.mrb[8].mxu0 %vm139_vm1, %v36_v18  ;;  %106 = vperm.xlu1 %814, %v52_v23  }
  0x15   :  { %693 = vmatprep.mubr.msk.f32.mxu0 %vm139_vm1, %v37_v20  ;;  %101 = vperm.xlu0 %813, %v51_v21  }
  0x18   :  { %694 = vmatmul.mubr.msk.f32.gmra.mrb[10].mxu0 %vm139_vm1, %v38_v22  ;;  %116 = vperm.xlu1 %814, %v54_v27  }
  0x19   :  { %696 = vmatprep.mubr.msk.f32.mxu0 %vm139_vm1, %v39_v24  ;;  %111 = vperm.xlu0 %813, %v53_v25  }
  0x1c   :  { %697 = vmatmul.mubr.msk.f32.gmra.mrb[12].mxu0 %vm139_vm1, %v40_v26  ;;  %126 = vperm.xlu1 %814, %v56_v31  }
  0x1d   :  { %699 = vmatprep.mubr.msk.f32.mxu0 %vm139_vm1, %v41_v28  ;;  %121 = vperm.xlu0 %813, %v55_v29  }
  0x20   :  { %700 = vmatmul.mubr.msk.f32.gmra.mrb[14].mxu0 %vm139_vm1, %v42_v30  ;;  %136 = vperm.xlu1 %814, %v58_v33  }
  0x21   :  { %131 = vperm.xlu0 %813, %v57_v32  }
  0x24   :  { %376 = vperm.xlu1 %814, %v362_v35  }
  0x25   :  { %371 = vperm.xlu0 %813, %v361_v34  }
  0x28   :  { %386 = vperm.xlu1 %814, %v364_v37  }
  0x29   :  { %381 = vperm.xlu0 %813, %v363_v36  }
  0x2c   :  { %396 = vperm.xlu1 %814, %v366_v39  }
  0x2d   :  { %391 = vperm.xlu0 %813, %v365_v38  }
  0x30   :  { %406 = vperm.xlu1 %814, %v368_v41  }
  0x31   :  { %401 = vperm.xlu0 %813, %v367_v40  }
  0x35   :  { %526 = vperm.xlu0 %813, %v523_v42  }
  0x83   :  { %v72_v44 = vpop.permute.xlu1 %71 }
  0x84   :  { %v62_v45 = vpop.permute.xlu0 %61 }
  0x87   :  { %v77_v46 = vpop.permute.xlu1 %76 }
  0x88   :  { %v67_v47 = vpop.permute.xlu0 %66 }
  0x8b   :  { %v87_v48 = vpop.permute.xlu1 %86 }
  0x8c   :  { %v82_v49 = vpop.permute.xlu0 %81 }
  0x8f   :  { %v97_v55 = vpop.permute.xlu1 %96 }
  0x90   :  { %v92_v58 = vpop.permute.xlu0 %91 }
  0x93   :  { %v107_v4 = vpop.permute.xlu1 %106 }
  0x94   :  { %v102_v7 = vpop.permute.xlu0 %101 }
  0x97   :  { %v117_v16 = vpop.permute.xlu1 %116 }
  0x98   :  { %v112_v19 = vpop.permute.xlu0 %111 }
  0x9b   :  { %v127_v29 = vpop.permute.xlu1 %126 }
  0x9c   :  { %v122_v32 = vpop.permute.xlu0 %121 }
  0x9f   :  { %v137_v41 = vpop.permute.xlu1 %136 }
  0xd7   :  { %v680_v50 = vpop.f32.mrb[0].mxu0 }
  0xd8   :  { %v264_v51 = vadd.f32 %v680_v50, %v67_v47  ;;  %v258_v52 = vpop.f32.mrb[1].mxu0 }
  0xd9   :  { %v259_v53 = vadd.f32 %v258_v52, %v62_v45  ;;  %v354_v52 = vld [vmem:[%s1036_s3 + $0x8] sm:$0xff] }
  0xda   :  { %v338_v54 = vmax.f32 %v264_v51, 0.0 }
  0xdb   :  { %v337_v56 = vmax.f32 %v259_v53, 0.0  ;;  %v683_v57 = vpop.f32.mrb[2].mxu0  ;;  %v355_v53 = vld [vmem:[%s1036_s3 + $0x10] sm:$0xff] }
  0xdc   :  { %v274_v59 = vadd.f32 %v683_v57, %v77_v46  ;;  %v268_v60 = vpop.f32.mrb[3].mxu0  ;;  %v359_v57 = vld [vmem:[%s1036_s3 + $0x30] sm:$0xff] }
  0xdd   :  { %v269_v61 = vadd.f32 %v268_v60, %v72_v44  ;;  %v765_v62 = vpack.c.bf16 %v338_v54, %v337_v56  ;;  %v132_v44 = vpop.permute.xlu0 %131  ;;  %v356_v54 = vld [vmem:[%s1036_s3 + $0x18] sm:$0xff]  ;;  %v358_v56 = vld [vmem:[%s1036_s3 + $0x28] sm:$0xff]  ;;  %v818_v60 = vmov 0.0  }
  0xde   :  { %v340_v63 = vmax.f32 %v274_v59, 0.0  ;;  %v816_v59 = vmov 0.0|0.0   ;;  %762 = vmatprep.mubr.msk.f32.mxu0 %vm817_vm2, %v818_v60 }
  0xdf   :  { %v339_v0 = vmax.f32 %v269_v61, 0.0  ;;  %v686_v1 = vpop.f32.mrb[4].mxu0  ;;  %766 = vmatprep.subr.bf16.mxu1 %v765_v62  ;;  %797 = vmatprep.subr.bf16.mxu0 %v816_v59  ;;  %v377_v61 = vpop.permute.xlu1 %376 }
  0xe0   :  { %v284_v2 = vadd.f32 %v686_v1, %v87_v48  ;;  %v278_v3 = vpop.f32.mrb[5].mxu0  ;;  %768 = vmatpush3.bf16.msra.mxu1 %v765_v62 }
  0xe1   :  { %v769_v5 = vpack.c.bf16 %v340_v63, %v339_v0  ;;  %v279_v6 = vadd.f32 %v278_v3, %v82_v49  ;;  %v372_v62 = vpop.permute.xlu0 %371 }
  0xe2   :  { %v342_v8 = vmax.f32 %v284_v2, 0.0 }
  0xe3   :  { %v341_v9 = vmax.f32 %v279_v6, 0.0  ;;  %v689_v10 = vpop.f32.mrb[6].mxu0  ;;  %770 = vmatprep.subr.bf16.mxu1 %v769_v5  ;;  %v387_v63 = vpop.permute.xlu1 %386 }
  0xe4   :  { %v294_v11 = vadd.f32 %v689_v10, %v97_v55  ;;  %v288_v12 = vpop.f32.mrb[7].mxu0  ;;  %772 = vmatpush3.bf16.msra.mxu1 %v769_v5  ;;  %v357_v55 = vld [vmem:[%s1036_s3 + $0x20] sm:$0xff] }
  0xe5   :  { %v773_v13 = vpack.c.bf16 %v342_v8, %v341_v9  ;;  %v289_v14 = vadd.f32 %v288_v12, %v92_v58  ;;  %v360_v58 = vld [vmem:[%s1036_s3 + $0x38] sm:$0xff]  ;;  %v382_v1 = vpop.permute.xlu0 %381 }
  0xe6   :  { %v344_v15 = vmax.f32 %v294_v11, 0.0 }
  0xe7   :  { %v343_v17 = vmax.f32 %v289_v14, 0.0  ;;  %v692_v18 = vpop.f32.mrb[8].mxu0  ;;  %774 = vmatprep.subr.bf16.mxu1 %v773_v13  ;;  %v397_v10 = vpop.permute.xlu1 %396 }
  0xe8   :  { %v304_v20 = vadd.f32 %v692_v18, %v107_v4  ;;  %v298_v21 = vpop.f32.mrb[9].mxu0  ;;  %776 = vmatpush3.bf16.msra.mxu1 %v773_v13 }
  0xe9   :  { %v777_v22 = vpack.c.bf16 %v344_v15, %v343_v17  ;;  %v299_v23 = vadd.f32 %v298_v21, %v102_v7  ;;  %v392_v13 = vpop.permute.xlu0 %391 }
  0xea   :  { %v346_v24 = vmax.f32 %v304_v20, 0.0 }
  0xeb   :  { %v345_v25 = vmax.f32 %v299_v23, 0.0  ;;  %v695_v26 = vpop.f32.mrb[10].mxu0  ;;  %778 = vmatprep.subr.bf16.mxu1 %v777_v22 }
  0xec   :  { %v314_v27 = vadd.f32 %v695_v26, %v117_v16  ;;  %v308_v28 = vpop.f32.mrb[11].mxu0  ;;  %780 = vmatpush3.bf16.msra.mxu1 %v777_v22  ;;  %v407_v22 = vpop.permute.xlu1 %406 }
  0xed   :  { %v781_v30 = vpack.c.bf16 %v346_v24, %v345_v25  ;;  %v309_v31 = vadd.f32 %v308_v28, %v112_v19  ;;  %v402_v25 = vpop.permute.xlu0 %401 }
  0xee   :  { %v348_v33 = vmax.f32 %v314_v27, 0.0 }
  0xef   :  { %v347_v34 = vmax.f32 %v309_v31, 0.0  ;;  %v698_v35 = vpop.f32.mrb[12].mxu0  ;;  %782 = vmatprep.subr.bf16.mxu1 %v781_v30 }
  0xf0   :  { %v324_v36 = vadd.f32 %v698_v35, %v127_v29  ;;  %v318_v37 = vpop.f32.mrb[13].mxu0  ;;  %784 = vmatpush3.bf16.msra.mxu1 %v781_v30 }
  0xf1   :  { %v785_v38 = vpack.c.bf16 %v348_v33, %v347_v34  ;;  %v319_v39 = vadd.f32 %v318_v37, %v122_v32  ;;  %v522_v33 = vld [vmem:[%s1037_s5] sm:$0x3]  ;;  %v527_v34 = vpop.permute.xlu0 %526 }
  0xf2   :  { %v350_v40 = vmax.f32 %v324_v36, 0.0 }
  0xf3   :  { %v349_v42 = vmax.f32 %v319_v39, 0.0  ;;  %v701_v43 = vpop.f32.mrb[14].mxu0  ;;  %786 = vmatprep.subr.bf16.mxu1 %v785_v38 }
  0xf4   :  { %v334_v45 = vadd.f32 %v701_v43, %v137_v41  ;;  %v328_v46 = vpop.f32.mrb[15].mxu0  ;;  %788 = vmatpush3.bf16.msra.mxu1 %v785_v38 }
  0xf5   :  { %v789_v47 = vpack.c.bf16 %v350_v40, %v349_v42  ;;  %v329_v48 = vadd.f32 %v328_v46, %v132_v44 }
  0xf6   :  { %v352_v49 = vmax.f32 %v334_v45, 0.0 }
  0xf7   :  { %v351_v50 = vmax.f32 %v329_v48, 0.0  ;;  %790 = vmatprep.subr.bf16.mxu1 %v789_v47 }
  0xf8   :  { %792 = vmatpush3.bf16.msra.mxu1 %v789_v47 }
  0xf9   :  { %v793_v51 = vpack.c.bf16 %v352_v49, %v351_v50 }
  0xfb   :  { %794 = vmatprep.subr.bf16.mxu1 %v793_v51 }
  0xfc   :  { %796 = vmatpush3.bf16.msra.mxu1 %v793_v51 }
  0xff   :  { %735 = vmatmul.mubr.f32.vlgmr.msra.gmra.mrb[0].mxu1 %v354_v52 }
 0x100   :  { %737 = vmatprep.mubr.f32.mxu1 %v355_v53 }
 0x103   :  { %738 = vmatmul.mubr.f32.gmra.mrb[2].mxu1 %v356_v54 }
 0x104   :  { %740 = vmatprep.mubr.f32.mxu1 %v357_v55 }
 0x107   :  { %741 = vmatmul.mubr.f32.gmra.mrb[4].mxu1 %v358_v56 }
 0x108   :  { %743 = vmatprep.mubr.f32.mxu1 %v359_v57 }
 0x10b   :  { %744 = vmatmul.mubr.f32.gmra.mrb[6].mxu1 %v360_v58 }
 0x1d2   :  { %v736_v0 = vpop.f32.mrb[0].mxu1 }
 0x1d3   :  { %v481_v2 = vadd.f32 %v736_v0, %v377_v61  ;;  %v475_v3 = vpop.f32.mrb[1].mxu1 }
 0x1d4   :  { %v476_v4 = vadd.f32 %v475_v3, %v372_v62 }
 0x1d5   :  { %v515_v5 = vmax.f32 %v481_v2, 0.0 }
 0x1d6   :  { %v514_v6 = vmax.f32 %v476_v4, 0.0  ;;  %v739_v7 = vpop.f32.mrb[2].mxu1 }
 0x1d7   :  { %v491_v8 = vadd.f32 %v739_v7, %v387_v63  ;;  %v485_v9 = vpop.f32.mrb[3].mxu1 }
 0x1d8   :  { %v798_v11 = vpack.c.bf16 %v515_v5, %v514_v6  ;;  %v486_v12 = vadd.f32 %v485_v9, %v382_v1 }
 0x1d9   :  { %v517_v14 = vmax.f32 %v491_v8, 0.0 }
 0x1da   :  { %v516_v15 = vmax.f32 %v486_v12, 0.0  ;;  %v742_v16 = vpop.f32.mrb[4].mxu1  ;;  %799 = vmatpush3.bf16.msra.mxu0 %v798_v11 }
 0x1db   :  { %v501_v17 = vadd.f32 %v742_v16, %v397_v10  ;;  %v495_v18 = vpop.f32.mrb[5].mxu1  ;;  %800 = vmatprep.subr.bf16.mxu0 %v816_v59 }
 0x1dc   :  { %v801_v19 = vpack.c.bf16 %v517_v14, %v516_v15  ;;  %v496_v20 = vadd.f32 %v495_v18, %v392_v13 }
 0x1dd   :  { %v519_v21 = vmax.f32 %v501_v17, 0.0 }
 0x1de   :  { %v518_v23 = vmax.f32 %v496_v20, 0.0  ;;  %v745_v24 = vpop.f32.mrb[6].mxu1  ;;  %802 = vmatpush3.bf16.msra.mxu0 %v801_v19 }
 0x1df   :  { %v511_v26 = vadd.f32 %v745_v24, %v407_v22  ;;  %v505_v27 = vpop.f32.mrb[7].mxu1  ;;  %803 = vmatprep.subr.bf16.mxu0 %v816_v59 }
 0x1e0   :  { %v804_v28 = vpack.c.bf16 %v519_v21, %v518_v23  ;;  %v506_v29 = vadd.f32 %v505_v27, %v402_v25 }
 0x1e1   :  { %v521_v30 = vmax.f32 %v511_v26, 0.0 }
 0x1e2   :  { %v520_v31 = vmax.f32 %v506_v29, 0.0  ;;  %805 = vmatpush3.bf16.msra.mxu0 %v804_v28 }
 0x1e3   :  { %806 = vmatprep.subr.bf16.mxu0 %v816_v59 }
 0x1e4   :  { %v807_v32 = vpack.c.bf16 %v521_v30, %v520_v31 }
 0x1e6   :  { %808 = vmatpush3.bf16.msra.mxu0 %v807_v32 }
 0x1e9   :  { %763 = vmatmul.mubr.msk.f32.vlgmr.msra.gmra.mrb[16].mxu0 %vm529_vm3, %v522_v33 }
 0x2bc   :  { %v599_v35 = vpop.f32.mrb[16].mxu0 }
 0x2bd   :  { %v600_v36 = vadd.f32 %v599_v35, %v527_v34  ;;  %v764_v37 = vpop.f32.mrb[17].mxu0 }
 0x2bf   :  { %603 = vst [vmem:[%s1038_s7] sm:$0x3] %v600_v36 }

</bundles_post_ra>
